<compile_context>
chip_gen: v7x
topology: tpu7x:2x2x1
jax: 0.10.0
libtpu: 0.0.40
codegen_flags: <defaults>
</compile_context>

<pallas_src>
import functools

import jax
import jax.numpy as jnp
import numpy as np
from jax import lax
from jax.experimental import pallas as pl
from jax.experimental.pallas import tpu as pltpu

BN_EPS = 1e-5


# --------------------------------------------------------------------------
# Pallas kernel: conv1 -> BN1 -> PReLU -> conv2 -> BN2 -> residual add
# --------------------------------------------------------------------------
def basic_block_kernel(x_ref, m1_ref, m2_ref, mask9_ref, s_ref, bn_ref,
                       alpha_ref, out_ref, *, W, C):
    NC, P = x_ref.shape                       # (N*C, H*W)
    N = NC // C
    inv_count = 1.0 / float(N * P)            # BN sample count per channel

    x = x_ref[...]                            # (NC, P) fp32, lane-dense
    mask9 = mask9_ref[...]                    # (9*NC, P) boundary validity

    def conv3x3(v, m_ref):
        # 9 taps via XLU lane rotations, stacked along sublanes, masked once,
        # then ONE (NC, 9*NC) @ (9*NC, P) MXU dot (fp32 accumulate).
        taps = []
        for k in range(9):
            ky, kx = k // 3 - 1, k % 3 - 1
            s = ky * W + kx                   # want tap[:, p] = v[:, p + s]
            taps.append(v if s == 0 else
                        pltpu.roll(v, shift=(-s) % P, axis=1))
        stacked = jnp.concatenate(taps, axis=0) * mask9        # (9*NC, P)
        return jnp.dot(m_ref[...], stacked,
                       preferred_element_type=jnp.float32)

    def batchnorm(v, g, be):
        # Lane-reduce first; s_ref[r, q] = 1 iff rows r, q hold the same
        # channel, so the tiny matvec sums each channel across the batch.
        # Single-pass var = E[x^2] - mean^2 (values here are O(1), no
        # cancellation risk at 1e-4 tolerance).
        row_sum = jnp.sum(v, axis=1, keepdims=True)            # (NC, 1)
        row_sq = jnp.sum(v * v, axis=1, keepdims=True)         # (NC, 1)
        mean = jnp.dot(s_ref[...], row_sum,
                       preferred_element_type=jnp.float32) * inv_count
        ex2 = jnp.dot(s_ref[...], row_sq,
                      preferred_element_type=jnp.float32) * inv_count
        var = ex2 - mean * mean
        return (v - mean) * lax.rsqrt(var + BN_EPS) * g + be

    g1, be1 = bn_ref[:, 0:1], bn_ref[:, 1:2]
    g2, be2 = bn_ref[:, 2:3], bn_ref[:, 3:4]

    # ---- conv1 + BN1 + PReLU (conv bias cancelled exactly by BN mean) ----
    y = batchnorm(conv3x3(x, m1_ref), g1, be1)
    alpha = alpha_ref[0]                                       # SMEM scalar
    y = jnp.where(y > 0.0, y, alpha * y)

    # ---- conv2 + BN2 + residual (full unmasked lane-dense store) ---------
    out_ref[...] = x + batchnorm(conv3x3(y, m2_ref), g2, be2)


# --------------------------------------------------------------------------
# Wrapper: free NCHW->(N*C, H*W) reshape + tiny parameter packing
# --------------------------------------------------------------------------
@jax.jit
def basic_block_forward(x_nchw, w1, b1, g1, be1, alpha, w2, b2, g2, be2):
    del b1, b2   # conv bias before training-mode BN has exactly zero effect
    N, C, H, W = x_nchw.shape
    P, NC = H * W, N * C
    x2d = x_nchw.reshape(NC, P).astype(jnp.float32)   # reshape only, no copy

    # PyTorch conv weight (Cout, Cin, 3, 3) -> one packed (NC, 9*NC) matrix;
    # columns [k*NC:(k+1)*NC] hold tap k's block-diag (over batch) weights.
    def packed_weight(w):
        wt = jnp.transpose(w.astype(jnp.float32), (2, 3, 0, 1)).reshape(9, C, C)
        eye = jnp.eye(N, dtype=jnp.float32)
        m = jnp.einsum('nm,koi->knomi', eye, wt).reshape(9, NC, NC)
        return jnp.transpose(m, (1, 0, 2)).reshape(NC, 9 * NC)

    m1, m2 = packed_weight(w1), packed_weight(w2)

    # Per-tap boundary masks pre-expanded to the stacked (9*NC, P) operand
    # (static; computed once at trace time) -> single in-kernel multiply.
    yy, xx = np.meshgrid(np.arange(H), np.arange(W), indexing='ij')
    mask9_np = np.zeros((9, NC, P), np.float32)
    for k in range(9):
        ky, kx = k // 3 - 1, k % 3 - 1
        valid = ((yy + ky >= 0) & (yy + ky < H) &
                 (xx + kx >= 0) & (xx + kx < W)).reshape(P)
        mask9_np[k] = valid[None, :]
    mask9 = jnp.asarray(mask9_np.reshape(9 * NC, P))

    # Channel selector across batch rows (for whole-batch BN statistics).
    rows = np.arange(NC)
    s_mat = jnp.asarray((rows[:, None] % C == rows[None, :] % C)
                        .astype(np.float32))

    # gamma1 | beta1 | gamma2 | beta2 packed into a single (NC, 4) operand.
    def per_row(p):
        return jnp.tile(p.reshape(1, C), (N, 1)).reshape(NC).astype(jnp.float32)

    bn_params = jnp.stack([per_row(g1), per_row(be1),
                           per_row(g2), per_row(be2)], axis=1)   # (NC, 4)

    vmem = pl.BlockSpec(memory_space=pltpu.MemorySpace.VMEM)
    smem = pl.BlockSpec(memory_space=pltpu.MemorySpace.SMEM)

    kernel = functools.partial(basic_block_kernel, W=W, C=C)
    out2d = pl.pallas_call(
        kernel,
        out_shape=jax.ShapeDtypeStruct((NC, P), jnp.float32),
        in_specs=[vmem, vmem, vmem, vmem, vmem, vmem,   # x, M1, M2, mask9, S, bn
                  smem],                                # PReLU alpha scalar
        out_specs=vmem,
    )(x2d, m1, m2, mask9, s_mat, bn_params, alpha.astype(jnp.float32))

    return out2d.reshape(N, C, H, W)                    # free reshape back


# --------------------------------------------------------------------------
# Spectral norm (weight reparameterization, PyTorch-style 1 power iteration)
# --------------------------------------------------------------------------
def spectral_normalize(w, u0, n_iter=1, eps=1e-12):
    cout = w.shape[0]
    wm = w.reshape(cout, -1)
    u = u0 / (jnp.linalg.norm(u0) + eps)
    v = None
    for _ in range(n_iter):
        v = wm.T @ u
        v = v / (jnp.linalg.norm(v) + eps)
        u = wm @ v
        u = u / (jnp.linalg.norm(u) + eps)
    sigma = jnp.dot(u, wm @ v)
    return w / sigma


# --------------------------------------------------------------------------
# Pure-JAX reference (NCHW), for a correctness check
# --------------------------------------------------------------------------
def reference_forward(x, w1, b1, g1, be1, alpha, w2, b2, g2, be2):
    def conv(z, w, b):
        y = jax.lax.conv_general_dilated(
            z, w, window_strides=(1, 1), padding=((1, 1), (1, 1)),
            dimension_numbers=("NCHW", "OIHW", "NCHW"))
        return y + b[None, :, None, None]

    def bn(z, g, be):
        mean = jnp.mean(z, axis=(0, 2, 3), keepdims=True)
        var = jnp.mean((z - mean) ** 2, axis=(0, 2, 3), keepdims=True)
        return ((z - mean) / jnp.sqrt(var + BN_EPS)
                * g[None, :, None, None] + be[None, :, None, None])

    y = bn(conv(x, w1, b1), g1, be1)
    y = jnp.maximum(y, 0.0) + alpha[0] * jnp.minimum(y, 0.0)
    y = bn(conv(y, w2, b2), g2, be2)
    return x + y


if __name__ == "__main__":
    key = jax.random.PRNGKey(0)
    N, C, H, W = 2, 4, 16, 16          # n_features = 4
    keys = jax.random.split(key, 8)

    x_nchw = jax.random.normal(keys[0], (N, C, H, W), jnp.float32)

    # Deterministic synthetic parameters (shapes from BasicBlock.__init__)
    w1_raw = jax.random.normal(keys[1], (C, C, 3, 3), jnp.float32) * 0.2
    b1 = jax.random.normal(keys[2], (C,), jnp.float32) * 0.1
    w2_raw = jax.random.normal(keys[3], (C, C, 3, 3), jnp.float32) * 0.2
    b2 = jax.random.normal(keys[4], (C,), jnp.float32) * 0.1
    u1 = jax.random.normal(keys[5], (C,), jnp.float32)
    u2 = jax.random.normal(keys[6], (C,), jnp.float32)

    gamma1 = jnp.ones((C,), jnp.float32)
    beta1 = jnp.zeros((C,), jnp.float32)
    gamma2 = jnp.ones((C,), jnp.float32)
    beta2 = jnp.zeros((C,), jnp.float32)
    alpha = jnp.full((1,), 0.25, jnp.float32)   # nn.PReLU() default init

    w1 = spectral_normalize(w1_raw, u1)
    w2 = spectral_normalize(w2_raw, u2)

    out = basic_block_forward(x_nchw, w1, b1, gamma1, beta1, alpha,
                              w2, b2, gamma2, beta2)
    out = jax.block_until_ready(out)

    ref = reference_forward(x_nchw, w1, b1, gamma1, beta1, alpha,
                            w2, b2, gamma2, beta2)
    np.testing.assert_allclose(np.asarray(out), np.asarray(ref),
                               rtol=1e-4, atol=1e-4)
    print("KERNEL_OK")
</pallas_src>

<mosaic_0001>
module attributes {stable_mosaic.version = 11 : i64} {
  func.func @basic_block_kernel(%arg0: memref<8x256xf32, #tpu.memory_space<vmem>>, %arg1: memref<8x72xf32, #tpu.memory_space<vmem>>, %arg2: memref<8x72xf32, #tpu.memory_space<vmem>>, %arg3: memref<72x256xf32, #tpu.memory_space<vmem>>, %arg4: memref<8x8xf32, #tpu.memory_space<vmem>>, %arg5: memref<8x4xf32, #tpu.memory_space<vmem>>, %arg6: memref<1xf32, #tpu.memory_space<smem>>, %arg7: memref<8x256xf32, #tpu.memory_space<vmem>>) attributes {dimension_semantics = [], scalar_prefetch = 0 : i64, scratch_operands = 0 : i64, tpu.core_type = #tpu.core_type<tc>} {
    %c0 = arith.constant 0 : index
    %c0_0 = arith.constant 0 : index
    %0 = vector.load %arg0[%c0, %c0_0] : memref<8x256xf32, #tpu.memory_space<vmem>>, vector<8x256xf32>
    %c0_1 = arith.constant 0 : index
    %c0_2 = arith.constant 0 : index
    %1 = vector.load %arg3[%c0_1, %c0_2] : memref<72x256xf32, #tpu.memory_space<vmem>>, vector<72x256xf32>
    %c0_3 = arith.constant 0 : index
    %c0_4 = arith.constant 0 : index
    %2 = vector.load %arg5[%c0_3, %c0_4] : memref<8x4xf32, #tpu.memory_space<vmem>>, vector<8x1xf32>
    %c0_5 = arith.constant 0 : index
    %c1 = arith.constant 1 : index
    %3 = vector.load %arg5[%c0_5, %c1] : memref<8x4xf32, #tpu.memory_space<vmem>>, vector<8x1xf32>
    %c0_6 = arith.constant 0 : index
    %c2 = arith.constant 2 : index
    %4 = vector.load %arg5[%c0_6, %c2] : memref<8x4xf32, #tpu.memory_space<vmem>>, vector<8x1xf32>
    %c0_7 = arith.constant 0 : index
    %c3 = arith.constant 3 : index
    %5 = vector.load %arg5[%c0_7, %c3] : memref<8x4xf32, #tpu.memory_space<vmem>>, vector<8x1xf32>
    %c17_i32 = arith.constant 17 : i32
    %6 = tpu.dynamic_rotate %0 by %c17_i32 dim 1 : vector<8x256xf32>, i32 -> vector<8x256xf32>
    %c16_i32 = arith.constant 16 : i32
    %7 = tpu.dynamic_rotate %0 by %c16_i32 dim 1 : vector<8x256xf32>, i32 -> vector<8x256xf32>
    %c15_i32 = arith.constant 15 : i32
    %8 = tpu.dynamic_rotate %0 by %c15_i32 dim 1 : vector<8x256xf32>, i32 -> vector<8x256xf32>
    %c1_i32 = arith.constant 1 : i32
    %9 = tpu.dynamic_rotate %0 by %c1_i32 dim 1 : vector<8x256xf32>, i32 -> vector<8x256xf32>
    %c255_i32 = arith.constant 255 : i32
    %10 = tpu.dynamic_rotate %0 by %c255_i32 dim 1 : vector<8x256xf32>, i32 -> vector<8x256xf32>
    %c241_i32 = arith.constant 241 : i32
    %11 = tpu.dynamic_rotate %0 by %c241_i32 dim 1 : vector<8x256xf32>, i32 -> vector<8x256xf32>
    %c240_i32 = arith.constant 240 : i32
    %12 = tpu.dynamic_rotate %0 by %c240_i32 dim 1 : vector<8x256xf32>, i32 -> vector<8x256xf32>
    %c239_i32 = arith.constant 239 : i32
    %13 = tpu.dynamic_rotate %0 by %c239_i32 dim 1 : vector<8x256xf32>, i32 -> vector<8x256xf32>
    %14 = tpu.concatenate %6, %7, %8, %9, %0, %10, %11, %12, %13 in 0 : vector<8x256xf32>, vector<8x256xf32>, vector<8x256xf32>, vector<8x256xf32>, vector<8x256xf32>, vector<8x256xf32>, vector<8x256xf32>, vector<8x256xf32>, vector<8x256xf32> -> vector<72x256xf32>
    %15 = arith.mulf %14, %1 : vector<72x256xf32>
    %c0_8 = arith.constant 0 : index
    %c0_9 = arith.constant 0 : index
    %16 = vector.load %arg1[%c0_8, %c0_9] : memref<8x72xf32, #tpu.memory_space<vmem>>, vector<8x72xf32>
    %cst = arith.constant dense<0.000000e+00> : vector<8x256xf32>
    %17 = tpu.matmul %16, %15, %cst {dimension_numbers = #tpu.dot_dimension_numbers<[1], [0], [0], [1], [0, 0, 1, 1], [], []>} : vector<8x72xf32>, vector<72x256xf32>, vector<8x256xf32> -> vector<8x256xf32>
    %cst_10 = arith.constant dense<0.000000e+00> : vector<8xf32>
    %18 = vector.multi_reduction <add>, %17, %cst_10 [1] : vector<8x256xf32> to vector<8xf32>
    %19 = vector.shape_cast %18 : vector<8xf32> to vector<8x1xf32>
    %20 = arith.mulf %17, %17 : vector<8x256xf32>
    %cst_11 = arith.constant dense<0.000000e+00> : vector<8xf32>
    %21 = vector.multi_reduction <add>, %20, %cst_11 [1] : vector<8x256xf32> to vector<8xf32>
    %22 = vector.shape_cast %21 : vector<8xf32> to vector<8x1xf32>
    %c0_12 = arith.constant 0 : index
    %c0_13 = arith.constant 0 : index
    %23 = vector.load %arg4[%c0_12, %c0_13] : memref<8x8xf32, #tpu.memory_space<vmem>>, vector<8x8xf32>
    %cst_14 = arith.constant dense<0.000000e+00> : vector<8x1xf32>
    %24 = tpu.matmul %23, %19, %cst_14 {dimension_numbers = #tpu.dot_dimension_numbers<[1], [0], [0], [1], [0, 0, 1, 1], [], []>} : vector<8x8xf32>, vector<8x1xf32>, vector<8x1xf32> -> vector<8x1xf32>
    %cst_15 = arith.constant 0.001953125 : f32
    %25 = vector.broadcast %cst_15 : f32 to vector<8x1xf32>
    %26 = arith.mulf %24, %25 : vector<8x1xf32>
    %c0_16 = arith.constant 0 : index
    %c0_17 = arith.constant 0 : index
    %27 = vector.load %arg4[%c0_16, %c0_17] : memref<8x8xf32, #tpu.memory_space<vmem>>, vector<8x8xf32>
    %cst_18 = arith.constant dense<0.000000e+00> : vector<8x1xf32>
    %28 = tpu.matmul %27, %22, %cst_18 {dimension_numbers = #tpu.dot_dimension_numbers<[1], [0], [0], [1], [0, 0, 1, 1], [], []>} : vector<8x8xf32>, vector<8x1xf32>, vector<8x1xf32> -> vector<8x1xf32>
    %cst_19 = arith.constant 0.001953125 : f32
    %29 = vector.broadcast %cst_19 : f32 to vector<8x1xf32>
    %30 = arith.mulf %28, %29 : vector<8x1xf32>
    %31 = arith.mulf %26, %26 : vector<8x1xf32>
    %32 = arith.subf %30, %31 : vector<8x1xf32>
    %33 = vector.broadcast %26 : vector<8x1xf32> to vector<8x256xf32>
    %34 = arith.subf %17, %33 : vector<8x256xf32>
    %cst_20 = arith.constant 9.99999974E-6 : f32
    %35 = vector.broadcast %cst_20 : f32 to vector<8x1xf32>
    %36 = arith.addf %32, %35 : vector<8x1xf32>
    %37 = math.rsqrt %36 : vector<8x1xf32>
    %38 = vector.broadcast %37 : vector<8x1xf32> to vector<8x256xf32>
    %39 = arith.mulf %34, %38 : vector<8x256xf32>
    %40 = vector.broadcast %2 : vector<8x1xf32> to vector<8x256xf32>
    %41 = arith.mulf %39, %40 : vector<8x256xf32>
    %42 = vector.broadcast %3 : vector<8x1xf32> to vector<8x256xf32>
    %43 = arith.addf %41, %42 : vector<8x256xf32>
    %c0_21 = arith.constant 0 : index
    %44 = memref.load %arg6[%c0_21] : memref<1xf32, #tpu.memory_space<smem>>
    %cst_22 = arith.constant 0.000000e+00 : f32
    %45 = vector.broadcast %cst_22 : f32 to vector<8x256xf32>
    %46 = arith.cmpf ogt, %43, %45 : vector<8x256xf32>
    %47 = vector.broadcast %44 : f32 to vector<8x256xf32>
    %48 = arith.mulf %47, %43 : vector<8x256xf32>
    %49 = arith.select %46, %43, %48 : vector<8x256xi1>, vector<8x256xf32>
    %c17_i32_23 = arith.constant 17 : i32
    %50 = tpu.dynamic_rotate %49 by %c17_i32_23 dim 1 : vector<8x256xf32>, i32 -> vector<8x256xf32>
    %c16_i32_24 = arith.constant 16 : i32
    %51 = tpu.dynamic_rotate %49 by %c16_i32_24 dim 1 : vector<8x256xf32>, i32 -> vector<8x256xf32>
    %c15_i32_25 = arith.constant 15 : i32
    %52 = tpu.dynamic_rotate %49 by %c15_i32_25 dim 1 : vector<8x256xf32>, i32 -> vector<8x256xf32>
    %c1_i32_26 = arith.constant 1 : i32
    %53 = tpu.dynamic_rotate %49 by %c1_i32_26 dim 1 : vector<8x256xf32>, i32 -> vector<8x256xf32>
    %c255_i32_27 = arith.constant 255 : i32
    %54 = tpu.dynamic_rotate %49 by %c255_i32_27 dim 1 : vector<8x256xf32>, i32 -> vector<8x256xf32>
    %c241_i32_28 = arith.constant 241 : i32
    %55 = tpu.dynamic_rotate %49 by %c241_i32_28 dim 1 : vector<8x256xf32>, i32 -> vector<8x256xf32>
    %c240_i32_29 = arith.constant 240 : i32
    %56 = tpu.dynamic_rotate %49 by %c240_i32_29 dim 1 : vector<8x256xf32>, i32 -> vector<8x256xf32>
    %c239_i32_30 = arith.constant 239 : i32
    %57 = tpu.dynamic_rotate %49 by %c239_i32_30 dim 1 : vector<8x256xf32>, i32 -> vector<8x256xf32>
    %58 = tpu.concatenate %50, %51, %52, %53, %49, %54, %55, %56, %57 in 0 : vector<8x256xf32>, vector<8x256xf32>, vector<8x256xf32>, vector<8x256xf32>, vector<8x256xf32>, vector<8x256xf32>, vector<8x256xf32>, vector<8x256xf32>, vector<8x256xf32> -> vector<72x256xf32>
    %59 = arith.mulf %58, %1 : vector<72x256xf32>
    %c0_31 = arith.constant 0 : index
    %c0_32 = arith.constant 0 : index
    %60 = vector.load %arg2[%c0_31, %c0_32] : memref<8x72xf32, #tpu.memory_space<vmem>>, vector<8x72xf32>
    %cst_33 = arith.constant dense<0.000000e+00> : vector<8x256xf32>
    %61 = tpu.matmul %60, %59, %cst_33 {dimension_numbers = #tpu.dot_dimension_numbers<[1], [0], [0], [1], [0, 0, 1, 1], [], []>} : vector<8x72xf32>, vector<72x256xf32>, vector<8x256xf32> -> vector<8x256xf32>
    %cst_34 = arith.constant dense<0.000000e+00> : vector<8xf32>
    %62 = vector.multi_reduction <add>, %61, %cst_34 [1] : vector<8x256xf32> to vector<8xf32>
    %63 = vector.shape_cast %62 : vector<8xf32> to vector<8x1xf32>
    %64 = arith.mulf %61, %61 : vector<8x256xf32>
    %cst_35 = arith.constant dense<0.000000e+00> : vector<8xf32>
    %65 = vector.multi_reduction <add>, %64, %cst_35 [1] : vector<8x256xf32> to vector<8xf32>
    %66 = vector.shape_cast %65 : vector<8xf32> to vector<8x1xf32>
    %c0_36 = arith.constant 0 : index
    %c0_37 = arith.constant 0 : index
    %67 = vector.load %arg4[%c0_36, %c0_37] : memref<8x8xf32, #tpu.memory_space<vmem>>, vector<8x8xf32>
    %cst_38 = arith.constant dense<0.000000e+00> : vector<8x1xf32>
    %68 = tpu.matmul %67, %63, %cst_38 {dimension_numbers = #tpu.dot_dimension_numbers<[1], [0], [0], [1], [0, 0, 1, 1], [], []>} : vector<8x8xf32>, vector<8x1xf32>, vector<8x1xf32> -> vector<8x1xf32>
    %cst_39 = arith.constant 0.001953125 : f32
    %69 = vector.broadcast %cst_39 : f32 to vector<8x1xf32>
    %70 = arith.mulf %68, %69 : vector<8x1xf32>
    %c0_40 = arith.constant 0 : index
    %c0_41 = arith.constant 0 : index
    %71 = vector.load %arg4[%c0_40, %c0_41] : memref<8x8xf32, #tpu.memory_space<vmem>>, vector<8x8xf32>
    %cst_42 = arith.constant dense<0.000000e+00> : vector<8x1xf32>
    %72 = tpu.matmul %71, %66, %cst_42 {dimension_numbers = #tpu.dot_dimension_numbers<[1], [0], [0], [1], [0, 0, 1, 1], [], []>} : vector<8x8xf32>, vector<8x1xf32>, vector<8x1xf32> -> vector<8x1xf32>
    %cst_43 = arith.constant 0.001953125 : f32
    %73 = vector.broadcast %cst_43 : f32 to vector<8x1xf32>
    %74 = arith.mulf %72, %73 : vector<8x1xf32>
    %75 = arith.mulf %70, %70 : vector<8x1xf32>
    %76 = arith.subf %74, %75 : vector<8x1xf32>
    %77 = vector.broadcast %70 : vector<8x1xf32> to vector<8x256xf32>
    %78 = arith.subf %61, %77 : vector<8x256xf32>
    %cst_44 = arith.constant 9.99999974E-6 : f32
    %79 = vector.broadcast %cst_44 : f32 to vector<8x1xf32>
    %80 = arith.addf %76, %79 : vector<8x1xf32>
    %81 = math.rsqrt %80 : vector<8x1xf32>
    %82 = vector.broadcast %81 : vector<8x1xf32> to vector<8x256xf32>
    %83 = arith.mulf %78, %82 : vector<8x256xf32>
    %84 = vector.broadcast %4 : vector<8x1xf32> to vector<8x256xf32>
    %85 = arith.mulf %83, %84 : vector<8x256xf32>
    %86 = vector.broadcast %5 : vector<8x1xf32> to vector<8x256xf32>
    %87 = arith.addf %85, %86 : vector<8x256xf32>
    %88 = arith.addf %0, %87 : vector<8x256xf32>
    %c0_45 = arith.constant 0 : index
    %c0_46 = arith.constant 0 : index
    %89 = vector.load %arg7[%c0_45, %c0_46] : memref<8x256xf32, #tpu.memory_space<vmem>>, vector<8x256xf32>
    tpu.vector_store %arg7[%c0_45, %c0_46], %88 {strides = array<i32>} : memref<8x256xf32, #tpu.memory_space<vmem>>, vector<8x256xf32>,
    return
  }
}

</mosaic_0001>

<bundles_post_ra>
// kernel: tile.18
= control target key start
LH: loop header
LB: loop body
LE: loop exit
PB: predicated region body
PF: predicated region fallthrough
CT: control target
= control target key end

     0   :  { %s22_s0 = inlined_call_operand.vmem [shape: f32[4], index: 0, kind: input, shape index: {}]   ;;  %s23_s1 = inlined_call_operand.vmem [shape: f32[2,1,1,4], index: 1, kind: output, shape index: {}]  }
   0x1   :  { %v4_v0 = vld [vmem:[%s22_s0] ss:$0 sm:$0xff] }
   0x2   :  { %5 = vst [vmem:[%s23_s1] sm:$0x3] %v4_v0 }

// kernel: tile.0
= control target key start
LH: loop header
LB: loop body
LE: loop exit
PB: predicated region body
PF: predicated region fallthrough
CT: control target
= control target key end

     0   :  { %s34_s8 = smov 125   ;;  %vm7_vm0 = vcmask 7168   ;;  %s35_s11 = smov 126   ;;  %s61_s0 = inlined_call_operand.vmem [shape: f32[2,1,1,4], index: 0, kind: input, shape index: {}]   ;;  %s62_s1 = inlined_call_operand.vmem [shape: f32[8,1], index: 1, kind: output, shape index: {}]  }
   0x1   :  { %v4_v0 = vld [vmem:[%s61_s0] sm:$0x3]  ;;  %s33_s0 = smov 127  }
   0x2   :  { %5 = vst [vmem:[#allocation0] sm:$0x3] %v4_v0 }
   0x9   :  { %v9_v1 = vld [vmem:[#allocation0] sm:$0x3]  }
   0xa   :  { %v21_v2 = vld [vmem:[#allocation0] sm:$0x3]   ;;  %10 = vrot.lane.b32.xlu0 %v9_v1, %s33_s0 }
   0xb   :  { %22 = vrot.lane.b32.xlu1 %v21_v2, %s34_s8  ;;  %v6_v3 = vld [vmem:[#allocation0] sm:$0x3]  }
   0xc   :  { %v15_v4 = vld [vmem:[#allocation0] sm:$0x3]   ;;  %8 = vst.msk [vmem:[%s62_s1] ss:$4 sm:$0x3] %vm7_vm0, %v6_v3  }
   0xe   :  { %16 = vrot.lane.b32.xlu0 %v15_v4, %s35_s11 }
  0x7c   :  { %v11_v5 = vpop.permute.xlu0 %10  }
  0x7d   :  { %v23_v6 = vpop.permute.xlu1 %22   ;;  %27 = vst.msk [vmem:[%s62_s1 + $0x1] ss:$4 sm:$0x3] %vm7_vm0, %v11_v5  }
  0x7e   :  { %29 = vst.msk [vmem:[%s62_s1 + $0x3] ss:$4 sm:$0x3] %vm7_vm0, %v23_v6  }
  0x80   :  { %v17_v7 = vpop.permute.xlu0 %16  }
  0x81   :  { %28 = vst.msk [vmem:[%s62_s1 + $0x2] ss:$4 sm:$0x3] %vm7_vm0, %v17_v7  }

// kernel: basic_block_forward.1
= control target key start
LH: loop header
LB: loop body
LE: loop exit
PB: predicated region body
PF: predicated region fallthrough
CT: control target
= control target key end

     0   :  { %s814_s26 = smov 16   ;;  %s815_s27 = smov 17   ;;  %v820_v2 = vmov 0.0   ;;  %v52_v3 = vlaneseq  ;;  %vm125_vm8 = vcmask 588800   ;;  %vm823_vm9 = vmmov 0   ;;  %s1183_s0 = inlined_call_operand.vmem [shape: f32[8,256], index: 0, kind: input, shape index: {}]   ;;  %s1184_s3 = inlined_call_operand.vmem [shape: f32[72,256], index: 3, kind: input, shape index: {}]   ;;  %s1185_s1 = inlined_call_operand.vmem [shape: f32[8,72], index: 1, kind: input, shape index: {}]   ;;  %s1186_s4 = inlined_call_operand.vmem [shape: f32[8,8], index: 4, kind: input, shape index: {}]   ;;  %s1187_s5 = inlined_call_operand.vmem [shape: f32[8,4], index: 5, kind: input, shape index: {}]   ;;  %s1188_s6 = inlined_call_operand.<no memory space> [shape: f32[1], index: 6, kind: input, shape index: {}]   ;;  %s1189_s2 = inlined_call_operand.vmem [shape: f32[8,72], index: 2, kind: input, shape index: {}]   ;;  %s1190_s7 = inlined_call_operand.vmem [shape: f32[8,256], index: 7, kind: output, shape index: {}]  }
   0x1   :  { %v871_v0 = vld [vmem:[%s1183_s0] sm:$0xff]  ;;  %v880_v1 = vld [vmem:[%s1183_s0 + $0x8] sm:$0xff]  ;;  %s816_s30 = smov 15   ;;  %s817_s8 = smov 1   ;;  %193 = vmatprep.mubr.f32.mxu0 %v820_v2  ;;  %737 = vmatprep.subr.mxu1 %v820_v2  ;;  %v917_v7 = vld [vmem:[%s1184_s3 + $0x10] sm:$0xff]  ;;  %vm209_vm10 = vcmask 64512  }
   0x2   :  { %57 = vrot.lane.b32.xlu1 %v871_v0, %s814_s26  ;;  %48 = vrot.lane.b32.xlu0 %v871_v0, %s815_s27  ;;  %s818_s0 = smov 127   ;;  %s819_s9 = smov 113   ;;  %v912_v4 = vand.u32 127, %v52_v3  ;;  %v924_v8 = vld [vmem:[%s1184_s3] sm:$0xff]  ;;  %v929_v9 = vld [vmem:[%s1184_s3 + $0x8] sm:$0xff] }
   0x3   :  { %s821_s10 = smov 112   ;;  %s822_s11 = smov 111   ;;  %v934_v10 = vld [vmem:[%s1184_s3 + $0x18] sm:$0xff]  ;;  %v952_v25 = vld [vmem:[%s1184_s3 + $0x20] sm:$0xff]  ;;  %v958_v26 = vld [vmem:[%s1184_s3 + $0x28] sm:$0xff]  ;;  %739 = vmatprep.mubr.msk.f32.mxu1 %vm823_vm9, %v820_v2 }
   0x4   :  { %vm61_vm0 = vcmp.lt.s32.totalorder %v912_v4, 16  ;;  %vm54_vm1 = vcmp.lt.s32.totalorder %v912_v4, 17  ;;  %vm68_vm2 = vcmp.lt.s32.totalorder %v912_v4, 15  ;;  %vm75_vm3 = vcmp.lt.s32.totalorder %v912_v4, 1  ;;  %v967_v29 = vld [vmem:[%s1184_s3 + $0x30] sm:$0xff]  ;;  %v972_v30 = vld [vmem:[%s1184_s3 + $0x38] sm:$0xff] }
   0x5   :  { %vm82_vm4 = vcmp.lt.s32.totalorder %v912_v4, 127  ;;  %v982_v35 = vld [vmem:[%s1184_s3 + $0x48] sm:$0xff]  ;;  %v987_v36 = vld [vmem:[%s1184_s3 + $0x40] sm:$0xff]  ;;  %v996_v41 = vld [vmem:[%s1184_s3 + $0x50] sm:$0xff]  ;;  %vm89_vm5 = vcmp.lt.s32.totalorder %v912_v4, 113  ;;  %vm96_vm6 = vcmp.lt.s32.totalorder %v912_v4, 112 }
   0x6   :  { %59 = vrot.lane.b32.xlu1 %v880_v1, %s814_s26  ;;  %50 = vrot.lane.b32.xlu0 %v880_v1, %s815_s27  ;;  %v1001_v42 = vld [vmem:[%s1184_s3 + $0x58] sm:$0xff]  ;;  %v115_v47 = vmul.f32 %v982_v35, %v880_v1  ;;  %v114_v48 = vmul.f32 %v987_v36, %v871_v0  ;;  %v1017_v57 = vld [vmem:[%s1184_s3 + $0x60] sm:$0xff]  ;;  %vm103_vm7 = vcmp.lt.s32.totalorder %v912_v4, 111 }
   0x7   :  { %v1023_v58 = vld [vmem:[%s1184_s3 + $0x68] sm:$0xff]  ;;  %v1032_v61 = vld [vmem:[%s1184_s3 + $0x70] sm:$0xff]  ;;  %v1037_v62 = vld [vmem:[%s1184_s3 + $0x78] sm:$0xff] }
   0xa   :  { %66 = vrot.lane.b32.xlu1 %v880_v1, %s816_s30  ;;  %64 = vrot.lane.b32.xlu0 %v871_v0, %s816_s30 }
   0xe   :  { %73 = vrot.lane.b32.xlu1 %v880_v1, %s817_s8  ;;  %71 = vrot.lane.b32.xlu0 %v871_v0, %s817_s8 }
  0x12   :  { %80 = vrot.lane.b32.xlu1 %v880_v1, %s818_s0  ;;  %78 = vrot.lane.b32.xlu0 %v871_v0, %s818_s0 }
  0x16   :  { %87 = vrot.lane.b32.xlu1 %v880_v1, %s819_s9  ;;  %85 = vrot.lane.b32.xlu0 %v871_v0, %s819_s9 }
  0x1a   :  { %94 = vrot.lane.b32.xlu1 %v880_v1, %s821_s10  ;;  %92 = vrot.lane.b32.xlu0 %v871_v0, %s821_s10 }
  0x1e   :  { %101 = vrot.lane.b32.xlu1 %v880_v1, %s822_s11  ;;  %99 = vrot.lane.b32.xlu0 %v871_v0, %s822_s11 }
  0x74   :  { %v58_v5 = vpop.permute.xlu1 %57  ;;  %v49_v6 = vpop.permute.xlu0 %48 }
  0x78   :  { %v60_v11 = vpop.permute.xlu1 %59  ;;  %v51_v12 = vpop.permute.xlu0 %50 }
  0x79   :  { %v62_v13 = vsel %vm61_vm0, %v58_v5, %v60_v11  ;;  %v63_v14 = vsel %vm61_vm0, %v60_v11, %v58_v5  ;;  %v55_v15 = vsel %vm54_vm1, %v49_v6, %v51_v12  ;;  %v56_v16 = vsel %vm54_vm1, %v51_v12, %v49_v6 }
  0x7a   :  { %v108_v17 = vmul.f32 %v63_v14, %v917_v7  ;;  %v106_v18 = vmul.f32 %v56_v16, %v924_v8  ;;  %v107_v19 = vmul.f32 %v55_v15, %v929_v9  ;;  %v109_v20 = vmul.f32 %v62_v13, %v934_v10  ;;  %v1051_v15 = vld [vmem:[%s1184_s3 + $0x88] sm:$0xff] }
  0x7c   :  { %v67_v21 = vpop.permute.xlu1 %66  ;;  %v65_v22 = vpop.permute.xlu0 %64  ;;  %v757_v23 = vpack.c.bf16 %v109_v20, %v107_v19  ;;  %v759_v24 = vpack.c.bf16 %v108_v17, %v106_v18  ;;  %v1056_v17 = vld [vmem:[%s1184_s3 + $0x80] sm:$0xff] }
  0x7d   :  { %v69_v27 = vsel %vm68_vm2, %v65_v22, %v67_v21  ;;  %v70_v28 = vsel %vm68_vm2, %v67_v21, %v65_v22 }
  0x7e   :  { %758 = vmatprep.subr.bf16.mxu0 %v757_v23  ;;  %v110_v37 = vmul.f32 %v70_v28, %v952_v25  ;;  %v111_v38 = vmul.f32 %v69_v27, %v958_v26  ;;  %v124_v27 = vld [vmem:[%s1185_s1] sm:$0xff] }
  0x7f   :  { %760 = vmatpush1.bf16.msra.mxu0 %v759_v24 }
  0x80   :  { %v74_v31 = vpop.permute.xlu1 %73  ;;  %v72_v32 = vpop.permute.xlu0 %71 }
  0x81   :  { %v76_v33 = vsel %vm75_vm3, %v72_v32, %v74_v31  ;;  %v77_v34 = vsel %vm75_vm3, %v74_v31, %v72_v32 }
  0x82   :  { %v112_v39 = vmul.f32 %v77_v34, %v967_v29  ;;  %v113_v40 = vmul.f32 %v76_v33, %v972_v30 }
  0x84   :  { %v81_v43 = vpop.permute.xlu1 %80  ;;  %v79_v44 = vpop.permute.xlu0 %78  ;;  %v761_v45 = vpack.c.bf16 %v113_v40, %v111_v38  ;;  %v763_v46 = vpack.c.bf16 %v112_v39, %v110_v37  ;;  %v1076_v38 = vld [vmem:[%s1186_s4] sm:$0xff] }
  0x85   :  { %v83_v49 = vsel %vm82_vm4, %v79_v44, %v81_v43  ;;  %v84_v50 = vsel %vm82_vm4, %v81_v43, %v79_v44  ;;  %v824_v43 = vmov 0   ;;  %v1089_v44 = vld [vmem:[%s1187_s5] sm:$0xff] }
  0x86   :  { %v116_v51 = vmul.f32 %v83_v49, %v996_v41  ;;  %v117_v52 = vmul.f32 %v84_v50, %v1001_v42  ;;  %762 = vmatprep.subr.bf16.mxu0 %v761_v45  ;;  %803 = vset.pattern.permute.xlu0 %v824_v43 }
  0x87   :  { %764 = vmatpush1.bf16.msra.mxu0 %v763_v46  ;;  %804 = vset.pattern.permute.xlu1 %v824_v43 }
  0x88   :  { %v88_v53 = vpop.permute.xlu1 %87  ;;  %v86_v54 = vpop.permute.xlu0 %85  ;;  %v765_v55 = vpack.c.bf16 %v117_v52, %v115_v47  ;;  %v767_v56 = vpack.c.bf16 %v116_v51, %v114_v48 }
  0x89   :  { %v90_v59 = vsel %vm89_vm5, %v86_v54, %v88_v53  ;;  %v91_v60 = vsel %vm89_vm5, %v88_v53, %v86_v54 }
  0x8a   :  { %766 = vmatprep.subr.bf16.mxu0 %v765_v55  ;;  %v118_v11 = vmul.f32 %v90_v59, %v1017_v57  ;;  %v119_v12 = vmul.f32 %v91_v60, %v1023_v58  ;;  %v825_v55 = vmov 1  }
  0x8b   :  { %768 = vmatpush1.bf16.msra.mxu0 %v767_v56 }
  0x8c   :  { %v95_v63 = vpop.permute.xlu1 %94  ;;  %v93_v3 = vpop.permute.xlu0 %92 }
  0x8d   :  { %v97_v5 = vsel %vm96_vm6, %v93_v3, %v95_v63  ;;  %v98_v6 = vsel %vm96_vm6, %v95_v63, %v93_v3 }
  0x8e   :  { %v120_v13 = vmul.f32 %v97_v5, %v1032_v61  ;;  %v121_v14 = vmul.f32 %v98_v6, %v1037_v62 }
  0x90   :  { %v102_v16 = vpop.permute.xlu1 %101  ;;  %v100_v18 = vpop.permute.xlu0 %99  ;;  %v769_v19 = vpack.c.bf16 %v121_v14, %v119_v12  ;;  %v771_v20 = vpack.c.bf16 %v120_v13, %v118_v11  ;;  %v389_v13 = vstv %s1188_s6 }
  0x91   :  { %v104_v21 = vsel %vm103_vm7, %v100_v18, %v102_v16  ;;  %v105_v22 = vsel %vm103_vm7, %v102_v16, %v100_v18 }
  0x92   :  { %v123_v23 = vmul.f32 %v105_v22, %v1051_v15  ;;  %770 = vmatprep.subr.bf16.mxu0 %v769_v19  ;;  %v122_v24 = vmul.f32 %v104_v21, %v1056_v17 }
  0x93   :  { %772 = vmatpush1.bf16.msra.mxu0 %v771_v20 }
  0x94   :  { %145 = vmatprep.subr.mxu0 %v123_v23 }
  0x97   :  { %146 = vmatpush1.msra.mxu0 %v122_v24 }
  0x98   :  { %723 = vmatmul.mubr.msk.f32.vlgmr.msra.gmra.mrb[0].mxu0 %vm125_vm8, %v124_v27  ;;  %747 = vmatprep.subr.mxu0 %v820_v2 }
  0x99   :  { %749 = vmatprep.mubr.msk.f32.mxu0 %vm823_vm9, %v820_v2 }
 0x16b   :  { %v195_v28 = vpop.f32.mrb[0].mxu0 }
 0x16c   :  { %v197_v31 = vpop.f32.mrb[1].mxu0  ;;  %v203_v32 = vmul.f32 %v195_v28, %v195_v28 }
 0x16d   :  { %v200_v33 = vadd.f32 %v197_v31, %v195_v28  ;;  %v204_v34 = vmul.f32 %v197_v31, %v197_v31 }
 0x16f   :  { %201 = vadd.xlane.f32.xlu0 %v200_v33  ;;  %v205_v37 = vadd.f32 %v204_v34, %v203_v32 }
 0x171   :  { %206 = vadd.xlane.f32.xlu1 %v205_v37 }
 0x182   :  { %375 = vperm.xlu1 %804, %v1089_v44  }
 0x1fc   :  { %v202_v39 = vpop.xlane.xlu0 %201 }
 0x1fd   :  { %738 = vmatpush3.msra.mxu1 %v202_v39 }
 0x1fe   :  { %v207_v40 = vpop.xlane.xlu1 %206  ;;  %740 = vmatmul.mubr.msk.f32.vlgmr.msra.gmra.mrb[0].mxu1 %vm209_vm10, %v1076_v38  ;;  %742 = vmatprep.subr.mxu1 %v820_v2 }
 0x1ff   :  { %743 = vmatpush3.msra.mxu1 %v207_v40  ;;  %744 = vmatprep.mubr.msk.f32.mxu1 %vm823_vm9, %v820_v2 }
 0x202   :  { %745 = vmatmul.mubr.msk.f32.vlgmr.msra.gmra.mrb[2].mxu1 %vm209_vm10, %v1076_v38  ;;  %v376_v56 = vpop.permute.xlu1 %375 }
 0x203   :  { %528 = vmatprep.mubr.f32.mxu1 %v820_v2 }
 0x2d1   :  { %v279_v45 = vpop.f32.mrb[0].mxu1 }
 0x2d2   :  { %v283_v46 = vmul.f32 0.001953125, %v279_v45  ;;  %v741_v47 = vpop.f32.mrb[1].mxu1 }
 0x2d4   :  { %359 = vperm.xlu0 %803, %v283_v46   ;;  %v355_v49 = vmul.f32 %v283_v46, %v283_v46 }
 0x2d5   :  { %v350_v48 = vpop.f32.mrb[2].mxu1 }
 0x2d6   :  { %v354_v50 = vmul.f32 0.001953125, %v350_v48  ;;  %v746_v51 = vpop.f32.mrb[3].mxu1 }
 0x2d8   :  { %v356_v52 = vsub.f32 %v354_v50, %v355_v49 }
 0x2da   :  { %v364_v53 = vadd.f32 1e-05, %v356_v52 }
 0x2dc   :  { %810 = vrsqrt.f32 %v364_v53 }
 0x2e6   :  { %v811_v54 = vpop.eup %810 }
 0x2e7   :  { %368 = vperm.xlu1 %804, %v811_v54  }
 0x2eb   :  { %805 = vset.pattern.permute.xlu1 %v825_v55 }
 0x2ec   :  { %381 = vperm.xlu1 %805, %v1089_v44  }
 0x2f0   :  { %806 = vset.pattern.permute.xlu1 %v824_v43 }
 0x353   :  { %v360_v59 = vpop.permute.xlu0 %359 }
 0x354   :  { %v362_v60 = vsub.f32 %v195_v28, %v360_v59  ;;  %v363_v63 = vsub.f32 %v197_v31, %v360_v59 }
 0x366   :  { %v369_v3 = vpop.permute.xlu1 %368 }
 0x367   :  { %v371_v5 = vmul.f32 %v369_v3, %v362_v60  ;;  %v372_v6 = vmul.f32 %v369_v3, %v363_v63 }
 0x369   :  { %v378_v11 = vmul.f32 %v376_v56, %v371_v5  ;;  %v379_v12 = vmul.f32 %v376_v56, %v372_v6 }
 0x36b   :  { %v382_v14 = vpop.permute.xlu1 %381 }
 0x36c   :  { %v384_v16 = vadd.f32 %v382_v14, %v378_v11  ;;  %v385_v18 = vadd.f32 %v382_v14, %v379_v12 }
 0x36e   :  { %vm387_vm11 = vcmp.gt.f32.partialorder %v384_v16, 0.0  ;;  %v390_v19 = vmul.f32 %v389_v13, %v384_v16  ;;  %v391_v20 = vmul.f32 %v389_v13, %v385_v18  ;;  %vm388_vm12 = vcmp.gt.f32.partialorder %v385_v18, 0.0 }
 0x370   :  { %v392_v21 = vsel %vm387_vm11, %v384_v16, %v390_v19  ;;  %v393_v22 = vsel %vm388_vm12, %v385_v18, %v391_v20 }
 0x371   :  { %406 = vrot.lane.b32.xlu0 %v392_v21, %s816_s30  ;;  %394 = vrot.lane.b32.xlu1 %v392_v21, %s815_s27  ;;  %v450_v6 = vmul.f32 %v392_v21, %v987_v36 }
 0x375   :  { %412 = vrot.lane.b32.xlu0 %v392_v21, %s817_s8  ;;  %396 = vrot.lane.b32.xlu1 %v393_v22, %s815_s27 }
 0x379   :  { %418 = vrot.lane.b32.xlu0 %v392_v21, %s818_s0  ;;  %400 = vrot.lane.b32.xlu1 %v392_v21, %s814_s26 }
 0x37d   :  { %424 = vrot.lane.b32.xlu0 %v392_v21, %s819_s9  ;;  %402 = vrot.lane.b32.xlu1 %v393_v22, %s814_s26 }
 0x381   :  { %430 = vrot.lane.b32.xlu0 %v392_v21, %s821_s10  ;;  %408 = vrot.lane.b32.xlu1 %v393_v22, %s816_s30 }
 0x385   :  { %436 = vrot.lane.b32.xlu0 %v392_v21, %s822_s11  ;;  %414 = vrot.lane.b32.xlu1 %v393_v22, %s817_s8 }
 0x389   :  { %420 = vrot.lane.b32.xlu1 %v393_v22, %s818_s0 }
 0x38d   :  { %426 = vrot.lane.b32.xlu1 %v393_v22, %s819_s9 }
 0x391   :  { %432 = vrot.lane.b32.xlu1 %v393_v22, %s821_s10 }
 0x395   :  { %438 = vrot.lane.b32.xlu1 %v393_v22, %s822_s11 }
 0x3e3   :  { %v395_v23 = vpop.permute.xlu1 %394  ;;  %v407_v27 = vpop.permute.xlu0 %406 }
 0x3e7   :  { %v397_v24 = vpop.permute.xlu1 %396  ;;  %v413_v33 = vpop.permute.xlu0 %412 }
 0x3e8   :  { %v398_v31 = vsel %vm54_vm1, %v395_v23, %v397_v24  ;;  %v399_v32 = vsel %vm54_vm1, %v397_v24, %v395_v23 }
 0x3e9   :  { %v442_v40 = vmul.f32 %v399_v32, %v924_v8  ;;  %v443_v43 = vmul.f32 %v398_v31, %v929_v9 }
 0x3eb   :  { %v401_v28 = vpop.permute.xlu1 %400  ;;  %v419_v50 = vpop.permute.xlu0 %418 }
 0x3ef   :  { %v403_v34 = vpop.permute.xlu1 %402  ;;  %v425_v56 = vpop.permute.xlu0 %424 }
 0x3f0   :  { %v404_v37 = vsel %vm61_vm0, %v401_v28, %v403_v34  ;;  %v405_v39 = vsel %vm61_vm0, %v403_v34, %v401_v28 }
 0x3f1   :  { %v444_v45 = vmul.f32 %v405_v39, %v917_v7  ;;  %v445_v46 = vmul.f32 %v404_v37, %v934_v10 }
 0x3f3   :  { %v775_v47 = vpack.c.bf16 %v444_v45, %v442_v40  ;;  %v409_v48 = vpop.permute.xlu1 %408  ;;  %v773_v49 = vpack.c.bf16 %v445_v46, %v443_v43  ;;  %v431_v13 = vpop.permute.xlu0 %430 }
 0x3f4   :  { %v410_v51 = vsel %vm68_vm2, %v407_v27, %v409_v48  ;;  %v411_v52 = vsel %vm68_vm2, %v409_v48, %v407_v27 }
 0x3f5   :  { %774 = vmatprep.subr.bf16.mxu1 %v773_v49  ;;  %v446_v9 = vmul.f32 %v411_v52, %v952_v25  ;;  %v447_v10 = vmul.f32 %v410_v51, %v958_v26  ;;  %v826_v49 = vmov 2   ;;  %v827_v51 = vmov 3  }
 0x3f6   :  { %776 = vmatpush1.bf16.msra.mxu1 %v775_v47 }
 0x3f7   :  { %v415_v53 = vpop.permute.xlu1 %414  ;;  %v437_v21 = vpop.permute.xlu0 %436 }
 0x3f8   :  { %v416_v8 = vsel %vm75_vm3, %v413_v33, %v415_v53  ;;  %v417_v7 = vsel %vm75_vm3, %v415_v53, %v413_v33 }
 0x3f9   :  { %v448_v54 = vmul.f32 %v417_v7, %v967_v29  ;;  %v449_v55 = vmul.f32 %v416_v8, %v972_v30  ;;  %v451_v29 = vmul.f32 %v393_v22, %v982_v35 }
 0x3fb   :  { %v779_v59 = vpack.c.bf16 %v448_v54, %v446_v9  ;;  %v421_v60 = vpop.permute.xlu1 %420  ;;  %v777_v63 = vpack.c.bf16 %v449_v55, %v447_v10 }
 0x3fc   :  { %v422_v3 = vsel %vm82_vm4, %v419_v50, %v421_v60  ;;  %v423_v5 = vsel %vm82_vm4, %v421_v60, %v419_v50 }
 0x3fd   :  { %v452_v25 = vmul.f32 %v422_v3, %v996_v41  ;;  %v453_v26 = vmul.f32 %v423_v5, %v1001_v42  ;;  %778 = vmatprep.subr.bf16.mxu1 %v777_v63 }
 0x3fe   :  { %780 = vmatpush1.bf16.msra.mxu1 %v779_v59 }
 0x3ff   :  { %v783_v30 = vpack.c.bf16 %v452_v25, %v450_v6  ;;  %v427_v11 = vpop.permute.xlu1 %426  ;;  %v781_v12 = vpack.c.bf16 %v453_v26, %v451_v29 }
 0x400   :  { %v428_v14 = vsel %vm89_vm5, %v425_v56, %v427_v11  ;;  %v429_v16 = vsel %vm89_vm5, %v427_v11, %v425_v56 }
 0x401   :  { %782 = vmatprep.subr.bf16.mxu1 %v781_v12  ;;  %v454_v42 = vmul.f32 %v428_v14, %v1017_v57  ;;  %v455_v18 = vmul.f32 %v429_v16, %v1023_v58  ;;  %v460_v58 = vld [vmem:[%s1189_s2] sm:$0xff] }
 0x402   :  { %784 = vmatpush1.bf16.msra.mxu1 %v783_v30 }
 0x403   :  { %v433_v36 = vpop.permute.xlu1 %432 }
 0x404   :  { %v434_v41 = vsel %vm96_vm6, %v431_v13, %v433_v36  ;;  %v435_v35 = vsel %vm96_vm6, %v433_v36, %v431_v13 }
 0x405   :  { %v456_v19 = vmul.f32 %v434_v41, %v1032_v61  ;;  %v457_v20 = vmul.f32 %v435_v35, %v1037_v62 }
 0x407   :  { %v787_v22 = vpack.c.bf16 %v456_v19, %v454_v42  ;;  %v439_v23 = vpop.permute.xlu1 %438  ;;  %v785_v24 = vpack.c.bf16 %v457_v20, %v455_v18 }
 0x408   :  { %v441_v27 = vsel %vm103_vm7, %v439_v23, %v437_v21  ;;  %v440_v28 = vsel %vm103_vm7, %v437_v21, %v439_v23 }
 0x409   :  { %v459_v31 = vmul.f32 %v441_v27, %v1051_v15  ;;  %786 = vmatprep.subr.bf16.mxu1 %v785_v24  ;;  %v458_v57 = vmul.f32 %v440_v28, %v1056_v17 }
 0x40a   :  { %788 = vmatpush1.bf16.msra.mxu1 %v787_v22 }
 0x40b   :  { %480 = vmatprep.subr.mxu1 %v459_v31 }
 0x40e   :  { %481 = vmatpush1.msra.mxu1 %v458_v57 }
 0x40f   :  { %726 = vmatmul.mubr.msk.f32.vlgmr.msra.gmra.mrb[4].mxu1 %vm125_vm8, %v460_v58 }
 0x4e2   :  { %v530_v61 = vpop.f32.mrb[4].mxu1 }
 0x4e3   :  { %v532_v62 = vpop.f32.mrb[5].mxu1  ;;  %v538_v32 = vmul.f32 %v530_v61, %v530_v61 }
 0x4e4   :  { %v539_v33 = vmul.f32 %v532_v62, %v532_v62  ;;  %v535_v4 = vadd.f32 %v532_v62, %v530_v61 }
 0x4e6   :  { %536 = vadd.xlane.f32.xlu0 %v535_v4  ;;  %v540_v34 = vadd.f32 %v539_v33, %v538_v32 }
 0x4e8   :  { %541 = vadd.xlane.f32.xlu1 %v540_v34 }
 0x573   :  { %v537_v15 = vpop.xlane.xlu0 %536 }
 0x574   :  { %748 = vmatpush3.msra.mxu0 %v537_v15 }
 0x575   :  { %v542_v37 = vpop.xlane.xlu1 %541  ;;  %750 = vmatmul.mubr.msk.f32.vlgmr.msra.gmra.mrb[2].mxu0 %vm209_vm10, %v1076_v38  ;;  %752 = vmatprep.subr.mxu0 %v820_v2 }
 0x576   :  { %753 = vmatpush3.msra.mxu0 %v542_v37  ;;  %754 = vmatprep.mubr.msk.f32.mxu0 %vm823_vm9, %v820_v2 }
 0x579   :  { %755 = vmatmul.mubr.msk.f32.vlgmr.msra.gmra.mrb[4].mxu0 %vm209_vm10, %v1076_v38 }
 0x648   :  { %v609_v17 = vpop.f32.mrb[2].mxu0 }
 0x649   :  { %v613_v39 = vmul.f32 0.001953125, %v609_v17  ;;  %v751_v40 = vpop.f32.mrb[3].mxu0 }
 0x64b   :  { %689 = vperm.xlu0 %803, %v613_v39   ;;  %v685_v45 = vmul.f32 %v613_v39, %v613_v39 }
 0x64c   :  { %v680_v43 = vpop.f32.mrb[4].mxu0 }
 0x64d   :  { %v684_v46 = vmul.f32 0.001953125, %v680_v43  ;;  %v756_v47 = vpop.f32.mrb[5].mxu0 }
 0x64f   :  { %v686_v48 = vsub.f32 %v684_v46, %v685_v45  ;;  %807 = vset.pattern.permute.xlu0 %v826_v49 }
 0x650   :  { %704 = vperm.xlu0 %807, %v1089_v44  }
 0x651   :  { %v694_v50 = vadd.f32 1e-05, %v686_v48 }
 0x653   :  { %812 = vrsqrt.f32 %v694_v50 }
 0x654   :  { %809 = vset.pattern.permute.xlu0 %v827_v51 }
 0x65d   :  { %v813_v2 = vpop.eup %812 }
 0x65e   :  { %698 = vperm.xlu1 %806, %v813_v2  }
 0x662   :  { %808 = vset.pattern.permute.xlu1 %v827_v51 }
 0x663   :  { %710 = vperm.xlu1 %808, %v1089_v44  }
 0x6ca   :  { %v690_v38 = vpop.permute.xlu0 %689 }
 0x6cb   :  { %v692_v52 = vsub.f32 %v530_v61, %v690_v38  ;;  %v693_v53 = vsub.f32 %v532_v62, %v690_v38 }
 0x6cf   :  { %v705_v7 = vpop.permute.xlu0 %704 }
 0x6dd   :  { %v699_v8 = vpop.permute.xlu1 %698 }
 0x6de   :  { %v701_v9 = vmul.f32 %v699_v8, %v692_v52  ;;  %v702_v10 = vmul.f32 %v699_v8, %v693_v53 }
 0x6e0   :  { %v707_v54 = vmul.f32 %v705_v7, %v701_v9  ;;  %v708_v55 = vmul.f32 %v705_v7, %v702_v10 }
 0x6e2   :  { %v711_v56 = vpop.permute.xlu1 %710 }
 0x6e3   :  { %v713_v59 = vadd.f32 %v711_v56, %v707_v54  ;;  %v714_v60 = vadd.f32 %v711_v56, %v708_v55 }
 0x6e5   :  { %v715_v63 = vadd.f32 %v713_v59, %v871_v0  ;;  %v716_v3 = vadd.f32 %v714_v60, %v880_v1 }
 0x6e7   :  { %717 = vst [vmem:[%s1190_s7] sm:$0xff] %v715_v63  ;;  %718 = vst [vmem:[%s1190_s7 + $0x8] sm:$0xff] %v716_v3 }

</bundles_post_ra>
